<compile_context>
chip_gen: v5e
topology: v5e:2x2
jax: 0.10.0
libtpu: 0.0.40
codegen_flags: <defaults>
</compile_context>

<pallas_src>
import functools
import math

import jax
import jax.numpy as jnp
from jax.experimental import pallas as pl
from jax.experimental.pallas import tpu as pltpu


LANE = 128             # batch tile must be a multiple of the lane width
SUBLANE = 8            # f32 sublane granularity (feature padding)
MAX_BATCH_TILE = 2048  # batch-tile upper bound (sweepable)


def _round_up(x, m):
    return (x + m - 1) // m * m


# ----------------------------------------------------------------------------
# Fused Pallas kernel: whole MLP, transposed (features x batch) layout.
# ----------------------------------------------------------------------------
def _mlp_kernel(x_ref, w_ref, b_ref, o_ref, *, n_layers, ninp, nout):
    # x: (ninp, TB) -- batch on lanes.  w: (L, F_PAD, F_PAD), (out, in)
    # orientation.  b: (L, F_PAD, 1).  o: (nout, TB).
    x = x_ref[...]
    if ninp == 1:
        # K == 1: broadcast-multiply on the VPU instead of a degenerate matmul.
        h = w_ref[0][:, :1] * x + b_ref[0]
    else:
        h = jnp.dot(w_ref[0][:, :ninp], x,
                    preferred_element_type=jnp.float32) + b_ref[0]
    if n_layers > 1:
        h = jnp.maximum(h, 0.0)
    # Small static layer count -> fully unrolled; scheduler sees everything.
    for i in range(1, n_layers):
        h = jnp.dot(w_ref[i], h, preferred_element_type=jnp.float32) + b_ref[i]
        if i < n_layers - 1:          # ReLU on every layer except the last
            h = jnp.maximum(h, 0.0)
    o_ref[...] = h[:nout, :]


@functools.partial(jax.jit, static_argnames=("ninp", "nout"))
def _forward_impl(w_stack, b_stack, x, *, ninp, nout):
    num_layers, f_pad, _ = w_stack.shape
    n = x.shape[0]

    # Batch on the lane axis; padding here touches only ninp * n_pad * 4 bytes.
    n_pad = _round_up(max(n, LANE), LANE)
    tb = min(n_pad, MAX_BATCH_TILE)
    if tb == n_pad and n_pad >= 2 * LANE:
        # v7x: give the 'parallel' batch axis >= 2 grid steps so it can shard
        # across both TensorCores.
        tb = _round_up(n_pad // 2, LANE)
    n_pad = _round_up(n_pad, tb)

    xt = jnp.pad(x.astype(jnp.float32).T, ((0, 0), (0, n_pad - n)))

    kern = functools.partial(_mlp_kernel, n_layers=num_layers,
                             ninp=ninp, nout=nout)
    out = pl.pallas_call(
        kern,
        out_shape=jax.ShapeDtypeStruct((nout, n_pad), jnp.float32),
        grid=(n_pad // tb,),
        in_specs=[
            # activations: tiled over the batch (lane) axis
            pl.BlockSpec((ninp, tb), lambda i: (0, i)),
            # weight / bias stacks: grid-invariant -> stay resident in VMEM
            pl.BlockSpec((num_layers, f_pad, f_pad), lambda i: (0, 0, 0)),
            pl.BlockSpec((num_layers, f_pad, 1), lambda i: (0, 0, 0)),
        ],
        out_specs=pl.BlockSpec((nout, tb), lambda i: (0, i)),
        compiler_params=pltpu.CompilerParams(
            dimension_semantics=("parallel",)),
    )(xt, w_stack, b_stack)

    return out[:, :n].T


def net_forward(padded_params, x):
    """Forward pass through the fused Pallas MLP kernel."""
    w_stack, b_stack, ninp, nout = padded_params
    return _forward_impl(w_stack, b_stack, x, ninp=ninp, nout=nout)


# ----------------------------------------------------------------------------
# Net construction (mirrors the PyTorch __init__ / init())
# ----------------------------------------------------------------------------
def make_nfilters(conf, ninp, nout):
    # torch.linspace(minf, maxf, nlayers+1).int()
    nf = jnp.linspace(conf['minf'], conf['maxf'], conf['nlayers'] + 1)
    nf = nf.astype(jnp.int32)
    nf = jnp.concatenate([nf, nf[:-1][::-1]], 0)
    nf = jnp.concatenate([jnp.array([ninp], jnp.int32), nf,
                          jnp.array([nout], jnp.int32)], 0)
    return [int(v) for v in nf]


def init_params(conf, ninp, nout, key):
    """xavier_uniform_ weights, bias filled with 0.01 (matches Net.init()).

    Returns:
      params: list of (W (out,in), b, is_last) for the pure-JAX reference.
      padded: (w_stack, b_stack, ninp, nout): zero-padded, (out,in)-oriented
              stacks for the fused kernel.  Padded rows/cols/bias entries are
              exactly 0.0, so padded feature rows stay 0 through
              matmul + bias + ReLU and numerics are preserved.
    """
    nfilters = make_nfilters(conf, ninp, nout)
    num_layers = len(nfilters) - 1
    f_pad = max(SUBLANE, _round_up(max(nfilters), SUBLANE))   # 64 for this conf

    params = []
    w_stack = jnp.zeros((num_layers, f_pad, f_pad), jnp.float32)
    b_stack = jnp.zeros((num_layers, f_pad, 1), jnp.float32)

    for i in range(1, len(nfilters)):
        cin, cout = nfilters[i - 1], nfilters[i]
        key, wk = jax.random.split(key)
        bound = math.sqrt(6.0 / (cin + cout))   # xavier uniform
        w = jax.random.uniform(wk, (cout, cin), jnp.float32,
                               minval=-bound, maxval=bound)
        b = jnp.full((cout,), 0.01, jnp.float32)
        last = (i == len(nfilters) - 1)
        params.append((w, b, last))

        w_stack = w_stack.at[i - 1, :cout, :cin].set(w)
        b_stack = b_stack.at[i - 1, :cout, 0].set(b)

    return params, (w_stack, b_stack, ninp, nout)


def net_forward_ref(params, x):
    """Pure-JAX reference (unpadded), true-f32 matmuls via precision='highest'."""
    for w, b, last in params:
        x = jnp.dot(x, w.T, precision="highest") + b
        if not last:
            x = jnp.maximum(x, 0.0)
    return x


# ----------------------------------------------------------------------------
if __name__ == "__main__":
    conf = {'minf': 16, 'maxf': 64, 'nlayers': 2,
            'use_batchnorm': False, 'non_linearity': 'relu', 'dropout': 0}

    ninp, nout = 1, 1
    batch = 8

    key = jax.random.PRNGKey(0)
    key, xk = jax.random.split(key)
    params, padded = init_params(conf, ninp, nout, key)

    x = jax.random.normal(xk, (batch, ninp), jnp.float32)

    out = net_forward(padded, x)
    out = jax.block_until_ready(out)

    ref = net_forward_ref(params, x)
    assert out.shape == (batch, nout), out.shape
    # Tolerance allows for bf16 multi-pass lowering of f32 matmuls on the MXU
    # (backend-default precision); real bugs (wrong orientation, missing
    # bias/ReLU, bad padding) produce O(0.1+) deviations.
    assert jnp.allclose(out, ref, atol=1e-2, rtol=1e-2), (out, ref)

    print("KERNEL_OK")
</pallas_src>

<mosaic_0001>
module attributes {stable_mosaic.version = 11 : i64} {
  func.func @_mlp_kernel(%arg0: i32, %arg1: memref<1x128xf32, #tpu.memory_space<vmem>>, %arg2: memref<6x64x64xf32, #tpu.memory_space<vmem>>, %arg3: memref<6x64x1xf32, #tpu.memory_space<vmem>>, %arg4: memref<1x128xf32, #tpu.memory_space<vmem>>) attributes {dimension_semantics = [#tpu.dimension_semantics<parallel>], iteration_bounds = array<i64: 1>, scalar_prefetch = 0 : i64, scratch_operands = 0 : i64, tpu.core_type = #tpu.core_type<tc>, window_params = [{transform_indices = @transform_0, window_bounds = array<i64: 1, 128>}, {pipeline_mode = #tpu.pipeline_mode<synchronous>, transform_indices = @transform_1, window_bounds = array<i64: 6, 64, 64>}, {pipeline_mode = #tpu.pipeline_mode<synchronous>, transform_indices = @transform_2, window_bounds = array<i64: 6, 64, 1>}, {transform_indices = @transform_3, window_bounds = array<i64: 1, 128>}]} {
    %c0 = arith.constant 0 : index
    %c0_0 = arith.constant 0 : index
    %0 = vector.load %arg1[%c0, %c0_0] : memref<1x128xf32, #tpu.memory_space<vmem>>, vector<1x128xf32>
    %c0_1 = arith.constant 0 : index
    %c0_2 = arith.constant 0 : index
    %c0_3 = arith.constant 0 : index
    %1 = vector.load %arg2[%c0_1, %c0_2, %c0_3] : memref<6x64x64xf32, #tpu.memory_space<vmem>>, vector<1x64x64xf32>
    %2 = vector.shape_cast %1 : vector<1x64x64xf32> to vector<64x64xf32>
    %3 = vector.extract_strided_slice %2 {offsets = [0, 0], sizes = [64, 1], strides = [1, 1]} : vector<64x64xf32> to vector<64x1xf32>
    %4 = vector.broadcast %3 : vector<64x1xf32> to vector<64x128xf32>
    %5 = vector.broadcast %0 : vector<1x128xf32> to vector<64x128xf32>
    %6 = arith.mulf %4, %5 : vector<64x128xf32>
    %c0_4 = arith.constant 0 : index
    %c0_5 = arith.constant 0 : index
    %c0_6 = arith.constant 0 : index
    %7 = vector.load %arg3[%c0_4, %c0_5, %c0_6] : memref<6x64x1xf32, #tpu.memory_space<vmem>>, vector<1x64x1xf32>
    %8 = vector.shape_cast %7 : vector<1x64x1xf32> to vector<64x1xf32>
    %9 = vector.broadcast %8 : vector<64x1xf32> to vector<64x128xf32>
    %10 = arith.addf %6, %9 : vector<64x128xf32>
    %cst = arith.constant 0.000000e+00 : f32
    %11 = vector.broadcast %cst : f32 to vector<64x128xf32>
    %12 = arith.maximumf %10, %11 : vector<64x128xf32>
    %c1 = arith.constant 1 : index
    %c0_7 = arith.constant 0 : index
    %c0_8 = arith.constant 0 : index
    %13 = vector.load %arg2[%c1, %c0_7, %c0_8] : memref<6x64x64xf32, #tpu.memory_space<vmem>>, vector<1x64x64xf32>
    %14 = vector.shape_cast %13 : vector<1x64x64xf32> to vector<64x64xf32>
    %cst_9 = arith.constant dense<0.000000e+00> : vector<64x128xf32>
    %15 = tpu.matmul %14, %12, %cst_9 {dimension_numbers = #tpu.dot_dimension_numbers<[1], [0], [0], [1], [0, 0, 1, 1], [], []>} : vector<64x64xf32>, vector<64x128xf32>, vector<64x128xf32> -> vector<64x128xf32>
    %c1_10 = arith.constant 1 : index
    %c0_11 = arith.constant 0 : index
    %c0_12 = arith.constant 0 : index
    %16 = vector.load %arg3[%c1_10, %c0_11, %c0_12] : memref<6x64x1xf32, #tpu.memory_space<vmem>>, vector<1x64x1xf32>
    %17 = vector.shape_cast %16 : vector<1x64x1xf32> to vector<64x1xf32>
    %18 = vector.broadcast %17 : vector<64x1xf32> to vector<64x128xf32>
    %19 = arith.addf %15, %18 : vector<64x128xf32>
    %cst_13 = arith.constant 0.000000e+00 : f32
    %20 = vector.broadcast %cst_13 : f32 to vector<64x128xf32>
    %21 = arith.maximumf %19, %20 : vector<64x128xf32>
    %c2 = arith.constant 2 : index
    %c0_14 = arith.constant 0 : index
    %c0_15 = arith.constant 0 : index
    %22 = vector.load %arg2[%c2, %c0_14, %c0_15] : memref<6x64x64xf32, #tpu.memory_space<vmem>>, vector<1x64x64xf32>
    %23 = vector.shape_cast %22 : vector<1x64x64xf32> to vector<64x64xf32>
    %cst_16 = arith.constant dense<0.000000e+00> : vector<64x128xf32>
    %24 = tpu.matmul %23, %21, %cst_16 {dimension_numbers = #tpu.dot_dimension_numbers<[1], [0], [0], [1], [0, 0, 1, 1], [], []>} : vector<64x64xf32>, vector<64x128xf32>, vector<64x128xf32> -> vector<64x128xf32>
    %c2_17 = arith.constant 2 : index
    %c0_18 = arith.constant 0 : index
    %c0_19 = arith.constant 0 : index
    %25 = vector.load %arg3[%c2_17, %c0_18, %c0_19] : memref<6x64x1xf32, #tpu.memory_space<vmem>>, vector<1x64x1xf32>
    %26 = vector.shape_cast %25 : vector<1x64x1xf32> to vector<64x1xf32>
    %27 = vector.broadcast %26 : vector<64x1xf32> to vector<64x128xf32>
    %28 = arith.addf %24, %27 : vector<64x128xf32>
    %cst_20 = arith.constant 0.000000e+00 : f32
    %29 = vector.broadcast %cst_20 : f32 to vector<64x128xf32>
    %30 = arith.maximumf %28, %29 : vector<64x128xf32>
    %c3 = arith.constant 3 : index
    %c0_21 = arith.constant 0 : index
    %c0_22 = arith.constant 0 : index
    %31 = vector.load %arg2[%c3, %c0_21, %c0_22] : memref<6x64x64xf32, #tpu.memory_space<vmem>>, vector<1x64x64xf32>
    %32 = vector.shape_cast %31 : vector<1x64x64xf32> to vector<64x64xf32>
    %cst_23 = arith.constant dense<0.000000e+00> : vector<64x128xf32>
    %33 = tpu.matmul %32, %30, %cst_23 {dimension_numbers = #tpu.dot_dimension_numbers<[1], [0], [0], [1], [0, 0, 1, 1], [], []>} : vector<64x64xf32>, vector<64x128xf32>, vector<64x128xf32> -> vector<64x128xf32>
    %c3_24 = arith.constant 3 : index
    %c0_25 = arith.constant 0 : index
    %c0_26 = arith.constant 0 : index
    %34 = vector.load %arg3[%c3_24, %c0_25, %c0_26] : memref<6x64x1xf32, #tpu.memory_space<vmem>>, vector<1x64x1xf32>
    %35 = vector.shape_cast %34 : vector<1x64x1xf32> to vector<64x1xf32>
    %36 = vector.broadcast %35 : vector<64x1xf32> to vector<64x128xf32>
    %37 = arith.addf %33, %36 : vector<64x128xf32>
    %cst_27 = arith.constant 0.000000e+00 : f32
    %38 = vector.broadcast %cst_27 : f32 to vector<64x128xf32>
    %39 = arith.maximumf %37, %38 : vector<64x128xf32>
    %c4 = arith.constant 4 : index
    %c0_28 = arith.constant 0 : index
    %c0_29 = arith.constant 0 : index
    %40 = vector.load %arg2[%c4, %c0_28, %c0_29] : memref<6x64x64xf32, #tpu.memory_space<vmem>>, vector<1x64x64xf32>
    %41 = vector.shape_cast %40 : vector<1x64x64xf32> to vector<64x64xf32>
    %cst_30 = arith.constant dense<0.000000e+00> : vector<64x128xf32>
    %42 = tpu.matmul %41, %39, %cst_30 {dimension_numbers = #tpu.dot_dimension_numbers<[1], [0], [0], [1], [0, 0, 1, 1], [], []>} : vector<64x64xf32>, vector<64x128xf32>, vector<64x128xf32> -> vector<64x128xf32>
    %c4_31 = arith.constant 4 : index
    %c0_32 = arith.constant 0 : index
    %c0_33 = arith.constant 0 : index
    %43 = vector.load %arg3[%c4_31, %c0_32, %c0_33] : memref<6x64x1xf32, #tpu.memory_space<vmem>>, vector<1x64x1xf32>
    %44 = vector.shape_cast %43 : vector<1x64x1xf32> to vector<64x1xf32>
    %45 = vector.broadcast %44 : vector<64x1xf32> to vector<64x128xf32>
    %46 = arith.addf %42, %45 : vector<64x128xf32>
    %cst_34 = arith.constant 0.000000e+00 : f32
    %47 = vector.broadcast %cst_34 : f32 to vector<64x128xf32>
    %48 = arith.maximumf %46, %47 : vector<64x128xf32>
    %c5 = arith.constant 5 : index
    %c0_35 = arith.constant 0 : index
    %c0_36 = arith.constant 0 : index
    %49 = vector.load %arg2[%c5, %c0_35, %c0_36] : memref<6x64x64xf32, #tpu.memory_space<vmem>>, vector<1x64x64xf32>
    %50 = vector.shape_cast %49 : vector<1x64x64xf32> to vector<64x64xf32>
    %cst_37 = arith.constant dense<0.000000e+00> : vector<64x128xf32>
    %51 = tpu.matmul %50, %48, %cst_37 {dimension_numbers = #tpu.dot_dimension_numbers<[1], [0], [0], [1], [0, 0, 1, 1], [], []>} : vector<64x64xf32>, vector<64x128xf32>, vector<64x128xf32> -> vector<64x128xf32>
    %c5_38 = arith.constant 5 : index
    %c0_39 = arith.constant 0 : index
    %c0_40 = arith.constant 0 : index
    %52 = vector.load %arg3[%c5_38, %c0_39, %c0_40] : memref<6x64x1xf32, #tpu.memory_space<vmem>>, vector<1x64x1xf32>
    %53 = vector.shape_cast %52 : vector<1x64x1xf32> to vector<64x1xf32>
    %54 = vector.broadcast %53 : vector<64x1xf32> to vector<64x128xf32>
    %55 = arith.addf %51, %54 : vector<64x128xf32>
    %56 = vector.extract_strided_slice %55 {offsets = [0, 0], sizes = [1, 128], strides = [1, 1]} : vector<64x128xf32> to vector<1x128xf32>
    %c0_41 = arith.constant 0 : index
    %c0_42 = arith.constant 0 : index
    %57 = vector.load %arg4[%c0_41, %c0_42] : memref<1x128xf32, #tpu.memory_space<vmem>>, vector<1x128xf32>
    tpu.vector_store %arg4[%c0_41, %c0_42], %56 {strides = array<i32>} : memref<1x128xf32, #tpu.memory_space<vmem>>, vector<1x128xf32>,
    return
  }
  func.func @transform_0(%arg0: i32) -> (i32, i32) {
    %c0_i32 = arith.constant 0 : i32
    %c0_i32_0 = arith.constant 0 : i32
    return %c0_i32, %arg0 : i32, i32
  }
  func.func @transform_1(%arg0: i32) -> (i32, i32, i32) {
    %c0_i32 = arith.constant 0 : i32
    %c0_i32_0 = arith.constant 0 : i32
    %c0_i32_1 = arith.constant 0 : i32
    %c0_i32_2 = arith.constant 0 : i32
    return %c0_i32, %c0_i32_0, %c0_i32_1 : i32, i32, i32
  }
  func.func @transform_2(%arg0: i32) -> (i32, i32, i32) {
    %c0_i32 = arith.constant 0 : i32
    %c0_i32_0 = arith.constant 0 : i32
    %c0_i32_1 = arith.constant 0 : i32
    %c0_i32_2 = arith.constant 0 : i32
    return %c0_i32, %c0_i32_0, %c0_i32_1 : i32, i32, i32
  }
  func.func @transform_3(%arg0: i32) -> (i32, i32) {
    %c0_i32 = arith.constant 0 : i32
    %c0_i32_0 = arith.constant 0 : i32
    return %c0_i32, %arg0 : i32, i32
  }
}

</mosaic_0001>

<bundles_post_ra>
// kernel: _forward_impl.1
= control target key start
LH: loop header
LB: loop body
LE: loop exit
PB: predicated region body
PF: predicated region fallthrough
CT: control target
= control target key end

     0   :  { %v926_v0 = vmov 0   ;;  %vm196_vm0 = vcmask 523264   ;;  %s1270_s2 = inlined_call_operand.vmem [shape: f32[6,64,1], index: 2, kind: input, shape index: {}]   ;;  %s1271_s1 = inlined_call_operand.vmem [shape: f32[6,64,64], index: 1, kind: input, shape index: {}]   ;;  %s1272_s0 = inlined_call_operand.vmem [shape: f32[1,128], index: 0, kind: input, shape index: {}]   ;;  %s1273_s3 = inlined_call_operand.vmem [shape: f32[1,128], index: 3, kind: output, shape index: {}]  }
   0x1   :  { %924 = vset.pattern.permute.xlu2 %v926_v0  ;;  %923 = vset.pattern.permute.xlu1 %v926_v0  ;;  %v81_v1 = vld [vmem:[%s1270_s2 + $0x38] sm:$0xff]  ;;  %v80_v2 = vld [vmem:[%s1270_s2 + $0x30] sm:$0xff]  ;;  %v20_v4 = vld [vmem:[%s1271_s1 + $0x28] sm:$0xff] }
   0x2   :  { %v22_v3 = vld [vmem:[%s1271_s1 + $0x38] sm:$0xff]  ;;  %922 = vset.pattern.permute.xlu0 %v926_v0  ;;  %119 = vperm.xlu1 %923, %v81_v1   ;;  %v21_v5 = vld [vmem:[%s1271_s1 + $0x30] sm:$0xff]  ;;  %v19_v6 = vld [vmem:[%s1271_s1 + $0x20] sm:$0xff] }
   0x3   :  { %114 = vperm.xlu2 %924, %v80_v2   ;;  %60 = vperm.xlu0 %922, %v22_v3   ;;  %v18_v7 = vld [vmem:[%s1271_s1 + $0x18] sm:$0xff]  ;;  %v79_v8 = vld [vmem:[%s1270_s2 + $0x28] sm:$0xff]  ;;  %v78_v9 = vld [vmem:[%s1270_s2 + $0x20] sm:$0xff] }
   0x4   :  { %v77_v10 = vld [vmem:[%s1270_s2 + $0x18] sm:$0xff]  ;;  %v17_v11 = vld [vmem:[%s1271_s1 + $0x10] sm:$0xff]  ;;  %v16_v12 = vld [vmem:[%s1271_s1 + $0x8] sm:$0xff] }
   0x5   :  { %v15_v13 = vld [vmem:[%s1271_s1] sm:$0xff]  ;;  %v76_v14 = vld [vmem:[%s1270_s2 + $0x10] sm:$0xff]  ;;  %v75_v15 = vld [vmem:[%s1270_s2 + $0x8] sm:$0xff] }
   0x6   :  { %v792_v16 = vld [vmem:[%s1270_s2 + $0x78] sm:$0xff]  ;;  %v74_v17 = vld [vmem:[%s1270_s2] sm:$0xff]  ;;  %v791_v18 = vld [vmem:[%s1270_s2 + $0x70] sm:$0xff] }
   0x7   :  { %v789_v19 = vld [vmem:[%s1270_s2 + $0x60] sm:$0xff]  ;;  %v790_v20 = vld [vmem:[%s1270_s2 + $0x68] sm:$0xff]  ;;  %v788_v21 = vld [vmem:[%s1270_s2 + $0x58] sm:$0xff] }
   0x8   :  { %v786_v22 = vld [vmem:[%s1270_s2 + $0x48] sm:$0xff]  ;;  %v787_v23 = vld [vmem:[%s1270_s2 + $0x50] sm:$0xff]  ;;  %v785_v24 = vld [vmem:[%s1270_s2 + $0x40] sm:$0xff] }
   0x9   :  { %v815_v25 = vld [vmem:[%s1270_s2 + $0xb0] sm:$0xff]  ;;  %v816_v26 = vld [vmem:[%s1270_s2 + $0xb8] sm:$0xff]  ;;  %v814_v27 = vld [vmem:[%s1270_s2 + $0xa8] sm:$0xff] }
   0xa   :  { %50 = vperm.xlu1 %923, %v20_v4   ;;  %v812_v28 = vld [vmem:[%s1270_s2 + $0x98] sm:$0xff]  ;;  %v813_v29 = vld [vmem:[%s1270_s2 + $0xa0] sm:$0xff]  ;;  %v811_v30 = vld [vmem:[%s1270_s2 + $0x90] sm:$0xff] }
   0xb   :  { %55 = vperm.xlu0 %922, %v21_v5   ;;  %45 = vperm.xlu2 %924, %v19_v6   ;;  %v809_v31 = vld [vmem:[%s1270_s2 + $0x80] sm:$0xff]  ;;  %v810_v32 = vld [vmem:[%s1270_s2 + $0x88] sm:$0xff]  ;;  %v840_v33 = vld [vmem:[%s1270_s2 + $0xf8] sm:$0xff] }
   0xc   :  { %v838_v34 = vld [vmem:[%s1270_s2 + $0xe8] sm:$0xff]  ;;  %v839_v35 = vld [vmem:[%s1270_s2 + $0xf0] sm:$0xff]  ;;  %v837_v36 = vld [vmem:[%s1270_s2 + $0xe0] sm:$0xff] }
   0xd   :  { %v835_v37 = vld [vmem:[%s1270_s2 + $0xd0] sm:$0xff]  ;;  %v836_v38 = vld [vmem:[%s1270_s2 + $0xd8] sm:$0xff]  ;;  %v834_v39 = vld [vmem:[%s1270_s2 + $0xc8] sm:$0xff] }
   0xe   :  { %v864_v40 = vld [vmem:[%s1270_s2 + $0x138] sm:$0xff]  ;;  %v833_v41 = vld [vmem:[%s1270_s2 + $0xc0] sm:$0xff]  ;;  %v863_v42 = vld [vmem:[%s1270_s2 + $0x130] sm:$0xff] }
   0xf   :  { %v861_v44 = vld [vmem:[%s1270_s2 + $0x120] sm:$0xff]  ;;  %v862_v45 = vld [vmem:[%s1270_s2 + $0x128] sm:$0xff]  ;;  %v860_v46 = vld [vmem:[%s1270_s2 + $0x118] sm:$0xff] }
  0x10   :  { %v1085_v47 = vld [vmem:[%s1272_s0] ss:$0 sm:$0xff]  ;;  %v858_v52 = vld [vmem:[%s1270_s2 + $0x108] sm:$0xff]  ;;  %v859_v54 = vld [vmem:[%s1270_s2 + $0x110] sm:$0xff] }
  0x11   :  { %v857_v55 = vld [vmem:[%s1270_s2 + $0x100] sm:$0xff] }
  0x12   :  { %40 = vperm.xlu1 %923, %v18_v7   ;;  %v881_v62 = vld [vmem:[%s1270_s2 + $0x140] sm:$0xff] }
  0x13   :  { %109 = vperm.xlu0 %922, %v79_v8   ;;  %104 = vperm.xlu2 %924, %v78_v9  }
  0x1a   :  { %99 = vperm.xlu1 %923, %v77_v10  }
  0x1b   :  { %35 = vperm.xlu0 %922, %v17_v11   ;;  %30 = vperm.xlu2 %924, %v16_v12  }
  0x22   :  { %25 = vperm.xlu1 %923, %v15_v13  }
  0x23   :  { %94 = vperm.xlu0 %922, %v76_v14   ;;  %89 = vperm.xlu2 %924, %v75_v15  }
  0x2a   :  { %193 = vperm.xlu1 %923, %v792_v16  }
  0x2b   :  { %84 = vperm.xlu0 %922, %v74_v17   ;;  %188 = vperm.xlu2 %924, %v791_v18  }
  0x32   :  { %178 = vperm.xlu1 %923, %v789_v19  }
  0x33   :  { %183 = vperm.xlu0 %922, %v790_v20   ;;  %173 = vperm.xlu2 %924, %v788_v21  }
  0x3a   :  { %163 = vperm.xlu1 %923, %v786_v22  }
  0x3b   :  { %168 = vperm.xlu0 %922, %v787_v23   ;;  %158 = vperm.xlu2 %924, %v785_v24  }
  0x42   :  { %320 = vperm.xlu1 %923, %v815_v25  }
  0x43   :  { %325 = vperm.xlu0 %922, %v816_v26   ;;  %315 = vperm.xlu2 %924, %v814_v27   ;;  %v777_v27 = vld [vmem:[%s1271_s1 + $0x40] sm:$0xff] }
  0x4a   :  { %305 = vperm.xlu1 %923, %v812_v28   ;;  %v779_v28 = vld [vmem:[%s1271_s1 + $0x50] sm:$0xff] }
  0x4b   :  { %310 = vperm.xlu0 %922, %v813_v29   ;;  %300 = vperm.xlu2 %924, %v811_v30   ;;  %v781_v29 = vld [vmem:[%s1271_s1 + $0x60] sm:$0xff]  ;;  %v783_v30 = vld [vmem:[%s1271_s1 + $0x70] sm:$0xff] }
  0x52   :  { %290 = vperm.xlu1 %923, %v809_v31   ;;  %v778_v31 = vld [vmem:[%s1271_s1 + $0x48] sm:$0xff] }
  0x53   :  { %295 = vperm.xlu0 %922, %v810_v32   ;;  %456 = vperm.xlu2 %924, %v840_v33   ;;  %v780_v32 = vld [vmem:[%s1271_s1 + $0x58] sm:$0xff]  ;;  %v782_v33 = vld [vmem:[%s1271_s1 + $0x68] sm:$0xff] }
  0x5a   :  { %446 = vperm.xlu1 %923, %v838_v34   ;;  %v784_v34 = vld [vmem:[%s1271_s1 + $0x78] sm:$0xff] }
  0x5b   :  { %451 = vperm.xlu0 %922, %v839_v35   ;;  %441 = vperm.xlu2 %924, %v837_v36  }
  0x5d   :  { %v115_v43 = vpop.permute.xlu2 %114 }
  0x62   :  { %431 = vperm.xlu1 %923, %v835_v37  }
  0x63   :  { %436 = vperm.xlu0 %922, %v836_v38   ;;  %426 = vperm.xlu2 %924, %v834_v39  }
  0x65   :  { %v46_v49 = vpop.permute.xlu2 %45 }
  0x66   :  { %v70_v63 = vmul.f32 %v1085_v47, %v46_v49 }
  0x6a   :  { %587 = vperm.xlu1 %923, %v864_v40  }
  0x6b   :  { %421 = vperm.xlu0 %922, %v833_v41   ;;  %582 = vperm.xlu2 %924, %v863_v42  }
  0x6d   :  { %v105_v60 = vpop.permute.xlu2 %104 }
  0x6e   :  { %v126_v4 = vadd.f32 %v105_v60, %v70_v63 }
  0x70   :  { %v134_v8 = vmax.f32 %v126_v4, 0.0  ;;  %v802_v4 = vld [vmem:[%s1271_s1 + $0x88] sm:$0xff] }
  0x72   :  { %572 = vperm.xlu1 %923, %v861_v44  }
  0x73   :  { %577 = vperm.xlu0 %922, %v862_v45   ;;  %567 = vperm.xlu2 %924, %v860_v46  }
  0x74   :  { %v120_v48 = vpop.permute.xlu1 %119 }
  0x75   :  { %v61_v50 = vpop.permute.xlu0 %60  ;;  %v31_v7 = vpop.permute.xlu2 %30 }
  0x76   :  { %v73_v51 = vmul.f32 %v1085_v47, %v61_v50  ;;  %v67_v14 = vmul.f32 %v1085_v47, %v31_v7  ;;  %v805_v7 = vld [vmem:[%s1271_s1 + $0xa0] sm:$0xff] }
  0x78   :  { %v129_v53 = vadd.f32 %v120_v48, %v73_v51 }
  0x7a   :  { %v137_v56 = vmax.f32 %v129_v53, 0.0  ;;  %557 = vperm.xlu1 %923, %v858_v52  }
  0x7b   :  { %562 = vperm.xlu0 %922, %v859_v54   ;;  %552 = vperm.xlu2 %924, %v857_v55  }
  0x7c   :  { %229 = vmatpush.msra.mxu0 %v137_v56  ;;  %897 = vmatpush.msra.mxu1 %v137_v56  ;;  %v51_v57 = vpop.permute.xlu1 %50 }
  0x7d   :  { %898 = vmatpush.msra.mxu2 %v137_v56  ;;  %899 = vmatpush.msra.mxu3 %v137_v56  ;;  %v56_v58 = vpop.permute.xlu0 %55  ;;  %v71_v1 = vmul.f32 %v1085_v47, %v51_v57  ;;  %v90_v15 = vpop.permute.xlu2 %89 }
  0x7e   :  { %v72_v59 = vmul.f32 %v1085_v47, %v56_v58  ;;  %v123_v18 = vadd.f32 %v90_v15, %v67_v14 }
  0x80   :  { %v128_v61 = vadd.f32 %v115_v43, %v72_v59  ;;  %v131_v22 = vmax.f32 %v123_v18, 0.0 }
  0x82   :  { %v136_v0 = vmax.f32 %v128_v61, 0.0 }
  0x83   :  { %683 = vperm.xlu0 %922, %v881_v62  }
  0x84   :  { %230 = vmatpush.msra.mxu0 %v136_v0  ;;  %900 = vmatpush.msra.mxu1 %v136_v0  ;;  %v41_v2 = vpop.permute.xlu1 %40 }
  0x85   :  { %901 = vmatpush.msra.mxu2 %v136_v0  ;;  %902 = vmatpush.msra.mxu3 %v136_v0  ;;  %v110_v3 = vpop.permute.xlu0 %109  ;;  %v69_v9 = vmul.f32 %v1085_v47, %v41_v2  ;;  %v189_v36 = vpop.permute.xlu2 %188 }
  0x86   :  { %v127_v5 = vadd.f32 %v110_v3, %v71_v1  ;;  %v801_v3 = vld [vmem:[%s1271_s1 + $0x80] sm:$0xff] }
  0x88   :  { %v135_v6 = vmax.f32 %v127_v5, 0.0  ;;  %v803_v5 = vld [vmem:[%s1271_s1 + $0x90] sm:$0xff] }
  0x8a   :  { %231 = vmatpush.msra.mxu0 %v135_v6  ;;  %903 = vmatpush.msra.mxu1 %v135_v6 }
  0x8b   :  { %904 = vmatpush.msra.mxu2 %v135_v6  ;;  %905 = vmatpush.msra.mxu3 %v135_v6  ;;  %v804_v6 = vld [vmem:[%s1271_s1 + $0x98] sm:$0xff] }
  0x8c   :  { %232 = vmatpush.msra.mxu0 %v134_v8  ;;  %906 = vmatpush.msra.mxu1 %v134_v8  ;;  %v100_v10 = vpop.permute.xlu1 %99 }
  0x8d   :  { %907 = vmatpush.msra.mxu2 %v134_v8  ;;  %908 = vmatpush.msra.mxu3 %v134_v8  ;;  %v125_v11 = vadd.f32 %v100_v10, %v69_v9  ;;  %v36_v12 = vpop.permute.xlu0 %35  ;;  %v806_v8 = vld [vmem:[%s1271_s1 + $0xa8] sm:$0xff]  ;;  %v807_v9 = vld [vmem:[%s1271_s1 + $0xb0] sm:$0xff]  ;;  %v808_v10 = vld [vmem:[%s1271_s1 + $0xb8] sm:$0xff] }
  0x8e   :  { %v68_v16 = vmul.f32 %v1085_v47, %v36_v12 }
  0x8f   :  { %v133_v13 = vmax.f32 %v125_v11, 0.0 }
  0x91   :  { %233 = vmatpush.msra.mxu0 %v133_v13  ;;  %909 = vmatpush.msra.mxu1 %v133_v13 }
  0x92   :  { %910 = vmatpush.msra.mxu2 %v133_v13  ;;  %911 = vmatpush.msra.mxu3 %v133_v13 }
  0x94   :  { %v26_v21 = vpop.permute.xlu1 %25 }
  0x95   :  { %v95_v17 = vpop.permute.xlu0 %94  ;;  %v66_v23 = vmul.f32 %v1085_v47, %v26_v21  ;;  %v174_v47 = vpop.permute.xlu2 %173 }
  0x96   :  { %v124_v19 = vadd.f32 %v95_v17, %v68_v16 }
  0x98   :  { %v132_v20 = vmax.f32 %v124_v19, 0.0 }
  0x9a   :  { %234 = vmatpush.msra.mxu0 %v132_v20  ;;  %912 = vmatpush.msra.mxu1 %v132_v20 }
  0x9b   :  { %913 = vmatpush.msra.mxu2 %v132_v20  ;;  %914 = vmatpush.msra.mxu3 %v132_v20 }
  0x9c   :  { %235 = vmatpush.msra.mxu0 %v131_v22  ;;  %915 = vmatpush.msra.mxu1 %v131_v22  ;;  %v194_v35 = vpop.permute.xlu1 %193 }
  0x9d   :  { %916 = vmatpush.msra.mxu2 %v131_v22  ;;  %917 = vmatpush.msra.mxu3 %v131_v22  ;;  %v85_v24 = vpop.permute.xlu0 %84  ;;  %v159_v62 = vpop.permute.xlu2 %158 }
  0x9e   :  { %v122_v25 = vadd.f32 %v85_v24, %v66_v23 }
  0xa0   :  { %v130_v26 = vmax.f32 %v122_v25, 0.0 }
  0xa2   :  { %236 = vmatpush.msra.mxu0 %v130_v26  ;;  %918 = vmatpush.msra.mxu1 %v130_v26 }
  0xa3   :  { %919 = vmatpush.msra.mxu2 %v130_v26  ;;  %920 = vmatpush.msra.mxu3 %v130_v26 }
  0xa4   :  { %793 = vmatmul.msk.f32.vlgmr.msra.gmra.mxu0 %vm196_vm0, %v777_v27  ;;  %795 = vmatmul.msk.f32.vlgmr.msra.gmra.mxu1 %vm196_vm0, %v779_v28  ;;  %v179_v42 = vpop.permute.xlu1 %178 }
  0xa5   :  { %797 = vmatmul.msk.f32.vlgmr.msra.gmra.mxu2 %vm196_vm0, %v781_v29  ;;  %799 = vmatmul.msk.f32.vlgmr.msra.gmra.mxu3 %vm196_vm0, %v783_v30  ;;  %v184_v40 = vpop.permute.xlu0 %183  ;;  %v316_v20 = vpop.permute.xlu2 %315 }
  0xac   :  { %794 = vmatmul.msk.f32.gmra.mxu0 %vm196_vm0, %v778_v31  ;;  %796 = vmatmul.msk.f32.gmra.mxu1 %vm196_vm0, %v780_v32  ;;  %v164_v59 = vpop.permute.xlu1 %163 }
  0xad   :  { %798 = vmatmul.msk.f32.gmra.mxu2 %vm196_vm0, %v782_v33  ;;  %800 = vmatmul.msk.f32.gmra.mxu3 %vm196_vm0, %v784_v34  ;;  %v169_v55 = vpop.permute.xlu0 %168  ;;  %v301_v32 = vpop.permute.xlu2 %300 }
  0xb4   :  { %v321_v18 = vpop.permute.xlu1 %320 }
  0xb5   :  { %v326_v17 = vpop.permute.xlu0 %325 }
  0xbc   :  { %v306_v25 = vpop.permute.xlu1 %305 }
  0xbd   :  { %v311_v21 = vpop.permute.xlu0 %310 }
 0x121   :  { %v244_v39 = vpop.f32.mrf.mxu1  ;;  %v238_v41 = vpop.f32.mrf.mxu0 }
 0x122   :  { %v245_v57 = vadd.f32 %v244_v39, %v169_v55  ;;  %v239_v63 = vadd.f32 %v238_v41, %v159_v62 }
 0x124   :  { %v264_v0 = vmax.f32 %v245_v57, 0.0  ;;  %v262_v2 = vmax.f32 %v239_v63, 0.0  ;;  %v457_v57 = vpop.permute.xlu2 %456 }
 0x128   :  { %v250_v37 = vpop.f32.mrf.mxu2  ;;  %v256_v38 = vpop.f32.mrf.mxu3 }
 0x129   :  { %v257_v45 = vadd.f32 %v256_v38, %v189_v36  ;;  %v247_v50 = vpop.f32.mrf.mxu1  ;;  %v251_v51 = vadd.f32 %v250_v37, %v179_v42  ;;  %v241_v56 = vpop.f32.mrf.mxu0 }
 0x12a   :  { %v248_v53 = vadd.f32 %v247_v50, %v174_v47  ;;  %v242_v60 = vadd.f32 %v241_v56, %v164_v59  ;;  %v291_v38 = vpop.permute.xlu1 %290  ;;  %v829_v47 = vld [vmem:[%s1271_s1 + $0xe0] sm:$0xff]  ;;  %v832_v50 = vld [vmem:[%s1271_s1 + $0xf8] sm:$0xff] }
 0x12b   :  { %v268_v52 = vmax.f32 %v257_v45, 0.0  ;;  %v266_v58 = vmax.f32 %v251_v51, 0.0  ;;  %v827_v45 = vld [vmem:[%s1271_s1 + $0xd0] sm:$0xff] }
 0x12c   :  { %v265_v61 = vmax.f32 %v248_v53, 0.0  ;;  %v263_v1 = vmax.f32 %v242_v60, 0.0 }
 0x130   :  { %v253_v43 = vpop.f32.mrf.mxu2  ;;  %v259_v44 = vpop.f32.mrf.mxu3 }
 0x131   :  { %v260_v46 = vadd.f32 %v259_v44, %v194_v35  ;;  %v254_v48 = vadd.f32 %v253_v43, %v184_v40  ;;  %v296_v35 = vpop.permute.xlu0 %295  ;;  %v825_v43 = vld [vmem:[%s1271_s1 + $0xc0] sm:$0xff]  ;;  %v826_v44 = vld [vmem:[%s1271_s1 + $0xc8] sm:$0xff] }
 0x132   :  { %v447_v60 = vpop.permute.xlu1 %446 }
 0x133   :  { %v269_v49 = vmax.f32 %v260_v46, 0.0  ;;  %v267_v54 = vmax.f32 %v254_v48, 0.0  ;;  %v828_v46 = vld [vmem:[%s1271_s1 + $0xd8] sm:$0xff]  ;;  %v830_v48 = vld [vmem:[%s1271_s1 + $0xe8] sm:$0xff] }
 0x135   :  { %360 = vmatpush.msrb.mxu1 %v269_v49  ;;  %v831_v49 = vld [vmem:[%s1271_s1 + $0xf0] sm:$0xff] }
 0x137   :  { %361 = vmatpush.msrb.mxu1 %v268_v52 }
 0x139   :  { %362 = vmatpush.msrb.mxu1 %v267_v54 }
 0x13b   :  { %363 = vmatpush.msrb.mxu1 %v266_v58  ;;  %v452_v58 = vpop.permute.xlu0 %451 }
 0x13d   :  { %364 = vmatpush.msrb.mxu1 %v265_v61  ;;  %v442_v61 = vpop.permute.xlu2 %441 }
 0x13f   :  { %365 = vmatpush.msrb.mxu1 %v264_v0 }
 0x141   :  { %366 = vmatpush.msrb.mxu1 %v263_v1 }
 0x143   :  { %367 = vmatpush.msrb.mxu1 %v262_v2  ;;  %v437_v1 = vpop.permute.xlu0 %436 }
 0x144   :  { %817 = vmatmul.msk.f32.vlgmr.msrb.gmra.mxu1 %vm196_vm0, %v801_v3 }
 0x14c   :  { %818 = vmatmul.msk.f32.gmra.mxu1 %vm196_vm0, %v802_v4 }
 0x154   :  { %819 = vmatmul.msk.f32.gmra.mxu1 %vm196_vm0, %v803_v5 }
 0x15c   :  { %820 = vmatmul.msk.f32.gmra.mxu1 %vm196_vm0, %v804_v6 }
 0x164   :  { %821 = vmatmul.msk.f32.gmra.mxu1 %vm196_vm0, %v805_v7 }
 0x16c   :  { %822 = vmatmul.msk.f32.gmra.mxu1 %vm196_vm0, %v806_v8  ;;  %v432_v8 = vpop.permute.xlu1 %431 }
 0x174   :  { %823 = vmatmul.msk.f32.gmra.mxu1 %vm196_vm0, %v807_v9 }
 0x17c   :  { %824 = vmatmul.msk.f32.gmra.mxu1 %vm196_vm0, %v808_v10 }
 0x1c1   :  { %v369_v11 = vpop.f32.mrf.mxu1 }
 0x1c2   :  { %v370_v39 = vadd.f32 %v369_v11, %v291_v38  ;;  %v427_v11 = vpop.permute.xlu2 %426 }
 0x1c4   :  { %v393_v42 = vmax.f32 %v370_v39, 0.0 }
 0x1c9   :  { %v372_v12 = vpop.f32.mrf.mxu1 }
 0x1ca   :  { %v373_v36 = vadd.f32 %v372_v12, %v296_v35 }
 0x1cc   :  { %v394_v41 = vmax.f32 %v373_v36, 0.0 }
 0x1d1   :  { %v375_v13 = vpop.f32.mrf.mxu1 }
 0x1d2   :  { %v376_v33 = vadd.f32 %v375_v13, %v301_v32 }
 0x1d4   :  { %v395_v40 = vmax.f32 %v376_v33, 0.0  ;;  %v588_v33 = vpop.permute.xlu1 %587 }
 0x1d9   :  { %v378_v14 = vpop.f32.mrf.mxu1 }
 0x1da   :  { %v379_v30 = vadd.f32 %v378_v14, %v306_v25  ;;  %v422_v14 = vpop.permute.xlu0 %421  ;;  %v855_v25 = vld [vmem:[%s1271_s1 + $0x130] sm:$0xff] }
 0x1dc   :  { %v396_v37 = vmax.f32 %v379_v30, 0.0 }
 0x1e1   :  { %v381_v15 = vpop.f32.mrf.mxu1 }
 0x1e2   :  { %v382_v28 = vadd.f32 %v381_v15, %v311_v21  ;;  %v851_v21 = vld [vmem:[%s1271_s1 + $0x110] sm:$0xff]  ;;  %v578_v36 = vpop.permute.xlu0 %577 }
 0x1e4   :  { %v397_v34 = vmax.f32 %v382_v28, 0.0 }
 0x1e9   :  { %v384_v16 = vpop.f32.mrf.mxu1 }
 0x1ea   :  { %v385_v26 = vadd.f32 %v384_v16, %v316_v20  ;;  %v850_v20 = vld [vmem:[%s1271_s1 + $0x108] sm:$0xff] }
 0x1ec   :  { %v398_v31 = vmax.f32 %v385_v26, 0.0  ;;  %v856_v26 = vld [vmem:[%s1271_s1 + $0x138] sm:$0xff] }
 0x1f1   :  { %v387_v19 = vpop.f32.mrf.mxu1 }
 0x1f2   :  { %v388_v23 = vadd.f32 %v387_v19, %v321_v18  ;;  %v849_v19 = vld [vmem:[%s1271_s1 + $0x100] sm:$0xff] }
 0x1f4   :  { %v399_v29 = vmax.f32 %v388_v23, 0.0  ;;  %v853_v23 = vld [vmem:[%s1271_s1 + $0x120] sm:$0xff] }
 0x1f9   :  { %v390_v22 = vpop.f32.mrf.mxu1 }
 0x1fa   :  { %v391_v24 = vadd.f32 %v390_v22, %v326_v17  ;;  %v852_v22 = vld [vmem:[%s1271_s1 + $0x118] sm:$0xff] }
 0x1fc   :  { %v400_v27 = vmax.f32 %v391_v24, 0.0  ;;  %v854_v24 = vld [vmem:[%s1271_s1 + $0x128] sm:$0xff] }
 0x1fe   :  { %491 = vmatpush.msrb.mxu2 %v400_v27 }
 0x200   :  { %492 = vmatpush.msrb.mxu2 %v399_v29 }
 0x202   :  { %493 = vmatpush.msrb.mxu2 %v398_v31 }
 0x204   :  { %494 = vmatpush.msrb.mxu2 %v397_v34  ;;  %v583_v34 = vpop.permute.xlu2 %582 }
 0x206   :  { %495 = vmatpush.msrb.mxu2 %v396_v37  ;;  %v573_v37 = vpop.permute.xlu1 %572 }
 0x208   :  { %496 = vmatpush.msrb.mxu2 %v395_v40 }
 0x20a   :  { %497 = vmatpush.msrb.mxu2 %v394_v41 }
 0x20c   :  { %498 = vmatpush.msrb.mxu2 %v393_v42  ;;  %v568_v41 = vpop.permute.xlu2 %567 }
 0x20d   :  { %841 = vmatmul.msk.f32.vlgmr.msrb.gmra.mxu2 %vm196_vm0, %v825_v43 }
 0x215   :  { %842 = vmatmul.msk.f32.gmra.mxu2 %vm196_vm0, %v826_v44 }
 0x21d   :  { %843 = vmatmul.msk.f32.gmra.mxu2 %vm196_vm0, %v827_v45 }
 0x225   :  { %844 = vmatmul.msk.f32.gmra.mxu2 %vm196_vm0, %v828_v46 }
 0x22d   :  { %845 = vmatmul.msk.f32.gmra.mxu2 %vm196_vm0, %v829_v47 }
 0x235   :  { %846 = vmatmul.msk.f32.gmra.mxu2 %vm196_vm0, %v830_v48  ;;  %v563_v48 = vpop.permute.xlu0 %562 }
 0x23d   :  { %847 = vmatmul.msk.f32.gmra.mxu2 %vm196_vm0, %v831_v49 }
 0x245   :  { %848 = vmatmul.msk.f32.gmra.mxu2 %vm196_vm0, %v832_v50 }
 0x290   :  { %v500_v51 = vpop.f32.mrf.mxu2 }
 0x291   :  { %v501_v15 = vadd.f32 %v500_v51, %v422_v14  ;;  %v558_v51 = vpop.permute.xlu1 %557 }
 0x293   :  { %v524_v18 = vmax.f32 %v501_v15, 0.0 }
 0x298   :  { %v503_v52 = vpop.f32.mrf.mxu2 }
 0x299   :  { %v504_v12 = vadd.f32 %v503_v52, %v427_v11 }
 0x29b   :  { %v525_v17 = vmax.f32 %v504_v12, 0.0 }
 0x2a0   :  { %v506_v53 = vpop.f32.mrf.mxu2 }
 0x2a1   :  { %v507_v9 = vadd.f32 %v506_v53, %v432_v8 }
 0x2a3   :  { %v526_v16 = vmax.f32 %v507_v9, 0.0 }
 0x2a8   :  { %v509_v54 = vpop.f32.mrf.mxu2 }
 0x2a9   :  { %v510_v6 = vadd.f32 %v509_v54, %v437_v1  ;;  %v553_v54 = vpop.permute.xlu2 %552  ;;  %v879_v1 = vld [vmem:[%s1271_s1 + $0x170] sm:$0xff] }
 0x2ab   :  { %v527_v13 = vmax.f32 %v510_v6, 0.0 }
 0x2b0   :  { %v512_v55 = vpop.f32.mrf.mxu2 }
 0x2b1   :  { %v513_v4 = vadd.f32 %v512_v55, %v442_v61  ;;  %v875_v61 = vld [vmem:[%s1271_s1 + $0x150] sm:$0xff] }
 0x2b3   :  { %v528_v10 = vmax.f32 %v513_v4, 0.0 }
 0x2b8   :  { %v515_v56 = vpop.f32.mrf.mxu2 }
 0x2b9   :  { %v516_v2 = vadd.f32 %v515_v56, %v447_v60  ;;  %v874_v60 = vld [vmem:[%s1271_s1 + $0x148] sm:$0xff] }
 0x2bb   :  { %v529_v7 = vmax.f32 %v516_v2, 0.0  ;;  %v880_v2 = vld [vmem:[%s1271_s1 + $0x178] sm:$0xff] }
 0x2c0   :  { %v518_v59 = vpop.f32.mrf.mxu2 }
 0x2c1   :  { %v519_v63 = vadd.f32 %v518_v59, %v452_v58  ;;  %v873_v59 = vld [vmem:[%s1271_s1 + $0x140] sm:$0xff] }
 0x2c3   :  { %v530_v5 = vmax.f32 %v519_v63, 0.0  ;;  %v877_v63 = vld [vmem:[%s1271_s1 + $0x160] sm:$0xff] }
 0x2c8   :  { %v521_v62 = vpop.f32.mrf.mxu2 }
 0x2c9   :  { %v522_v0 = vadd.f32 %v521_v62, %v457_v57  ;;  %v876_v62 = vld [vmem:[%s1271_s1 + $0x158] sm:$0xff] }
 0x2cb   :  { %v531_v3 = vmax.f32 %v522_v0, 0.0  ;;  %v878_v0 = vld [vmem:[%s1271_s1 + $0x168] sm:$0xff] }
 0x2cd   :  { %622 = vmatpush.msrb.mxu3 %v531_v3  ;;  %v684_v3 = vpop.permute.xlu0 %683 }
 0x2cf   :  { %623 = vmatpush.msrb.mxu3 %v530_v5 }
 0x2d1   :  { %624 = vmatpush.msrb.mxu3 %v529_v7 }
 0x2d3   :  { %625 = vmatpush.msrb.mxu3 %v528_v10 }
 0x2d5   :  { %626 = vmatpush.msrb.mxu3 %v527_v13 }
 0x2d7   :  { %627 = vmatpush.msrb.mxu3 %v526_v16 }
 0x2d9   :  { %628 = vmatpush.msrb.mxu3 %v525_v17 }
 0x2db   :  { %629 = vmatpush.msrb.mxu3 %v524_v18 }
 0x2dc   :  { %865 = vmatmul.msk.f32.vlgmr.msrb.gmra.mxu3 %vm196_vm0, %v849_v19 }
 0x2e4   :  { %866 = vmatmul.msk.f32.gmra.mxu3 %vm196_vm0, %v850_v20 }
 0x2ec   :  { %867 = vmatmul.msk.f32.gmra.mxu3 %vm196_vm0, %v851_v21 }
 0x2f4   :  { %868 = vmatmul.msk.f32.gmra.mxu3 %vm196_vm0, %v852_v22 }
 0x2fc   :  { %869 = vmatmul.msk.f32.gmra.mxu3 %vm196_vm0, %v853_v23 }
 0x304   :  { %870 = vmatmul.msk.f32.gmra.mxu3 %vm196_vm0, %v854_v24 }
 0x30c   :  { %871 = vmatmul.msk.f32.gmra.mxu3 %vm196_vm0, %v855_v25 }
 0x314   :  { %872 = vmatmul.msk.f32.gmra.mxu3 %vm196_vm0, %v856_v26 }
 0x35f   :  { %v631_v27 = vpop.f32.mrf.mxu3 }
 0x360   :  { %v632_v55 = vadd.f32 %v631_v27, %v553_v54 }
 0x362   :  { %v655_v58 = vmax.f32 %v632_v55, 0.0 }
 0x367   :  { %v634_v28 = vpop.f32.mrf.mxu3 }
 0x368   :  { %v635_v52 = vadd.f32 %v634_v28, %v558_v51 }
 0x36a   :  { %v656_v57 = vmax.f32 %v635_v52, 0.0 }
 0x36f   :  { %v637_v29 = vpop.f32.mrf.mxu3 }
 0x370   :  { %v638_v49 = vadd.f32 %v637_v29, %v563_v48 }
 0x372   :  { %v657_v56 = vmax.f32 %v638_v49, 0.0 }
 0x377   :  { %v640_v30 = vpop.f32.mrf.mxu3 }
 0x378   :  { %v641_v46 = vadd.f32 %v640_v30, %v568_v41 }
 0x37a   :  { %v658_v53 = vmax.f32 %v641_v46, 0.0 }
 0x37f   :  { %v643_v31 = vpop.f32.mrf.mxu3 }
 0x380   :  { %v644_v44 = vadd.f32 %v643_v31, %v573_v37 }
 0x382   :  { %v659_v50 = vmax.f32 %v644_v44, 0.0 }
 0x387   :  { %v646_v32 = vpop.f32.mrf.mxu3 }
 0x388   :  { %v647_v42 = vadd.f32 %v646_v32, %v578_v36 }
 0x38a   :  { %v660_v47 = vmax.f32 %v647_v42, 0.0 }
 0x38f   :  { %v649_v35 = vpop.f32.mrf.mxu3 }
 0x390   :  { %v650_v39 = vadd.f32 %v649_v35, %v583_v34 }
 0x392   :  { %v661_v45 = vmax.f32 %v650_v39, 0.0 }
 0x397   :  { %v652_v38 = vpop.f32.mrf.mxu3 }
 0x398   :  { %v653_v40 = vadd.f32 %v652_v38, %v588_v33 }
 0x39a   :  { %v662_v43 = vmax.f32 %v653_v40, 0.0 }
 0x39c   :  { %746 = vmatpush.msrb.mxu0 %v662_v43 }
 0x39e   :  { %747 = vmatpush.msrb.mxu0 %v661_v45 }
 0x3a0   :  { %748 = vmatpush.msrb.mxu0 %v660_v47 }
 0x3a2   :  { %749 = vmatpush.msrb.mxu0 %v659_v50 }
 0x3a4   :  { %750 = vmatpush.msrb.mxu0 %v658_v53 }
 0x3a6   :  { %751 = vmatpush.msrb.mxu0 %v657_v56 }
 0x3a8   :  { %752 = vmatpush.msrb.mxu0 %v656_v57 }
 0x3aa   :  { %753 = vmatpush.msrb.mxu0 %v655_v58 }
 0x3ab   :  { %889 = vmatmul.msk.f32.vlgmr.msrb.gmra.mxu0 %vm196_vm0, %v873_v59 }
 0x3b3   :  { %890 = vmatmul.msk.f32.gmra.mxu0 %vm196_vm0, %v874_v60 }
 0x3bb   :  { %891 = vmatmul.msk.f32.gmra.mxu0 %vm196_vm0, %v875_v61 }
 0x3c3   :  { %892 = vmatmul.msk.f32.gmra.mxu0 %vm196_vm0, %v876_v62 }
 0x3cb   :  { %893 = vmatmul.msk.f32.gmra.mxu0 %vm196_vm0, %v877_v63 }
 0x3d3   :  { %894 = vmatmul.msk.f32.gmra.mxu0 %vm196_vm0, %v878_v0 }
 0x3db   :  { %895 = vmatmul.msk.f32.gmra.mxu0 %vm196_vm0, %v879_v1 }
 0x3e3   :  { %896 = vmatmul.msk.f32.gmra.mxu0 %vm196_vm0, %v880_v2 }
 0x428   :  { %v755_v4 = vpop.f32.mrf.mxu0 }
 0x429   :  { %v756_v5 = vadd.f32 %v755_v4, %v684_v3 }
 0x42b   :  { %772 = vst [vmem:[%s1273_s3] sm:$0x1] %v756_v5 }
 0x430   :  { %v758_v6 = vpop.f32.mrf.mxu0 }
 0x438   :  { %v760_v7 = vpop.f32.mrf.mxu0 }
 0x440   :  { %v762_v8 = vpop.f32.mrf.mxu0 }
 0x448   :  { %v764_v9 = vpop.f32.mrf.mxu0 }
 0x450   :  { %v766_v10 = vpop.f32.mrf.mxu0 }
 0x458   :  { %v768_v11 = vpop.f32.mrf.mxu0 }
 0x460   :  { %v770_v12 = vpop.f32.mrf.mxu0 }

</bundles_post_ra>
